<compile_context>
chip_gen: v7x
topology: tpu7x:2x2x1
jax: 0.10.0
libtpu: 0.0.40
codegen_flags: <defaults>
</compile_context>

<pallas_src>
import functools
import math

import jax
import jax.numpy as jnp
from jax.experimental import pallas as pl
from jax.experimental.pallas import tpu as pltpu

IMAGENET_MEAN = (0.485, 0.456, 0.406)
IMAGENET_STD = (0.229, 0.224, 0.225)

_ROW_GRANULE = 32          # uint8 sublane tile -> keep split tiles 32-row aligned
_MAX_ROWS = 4096           # 4096*128 = 524288 px/block; safe on v5e/v6e/v7x VMEM


def _cdiv(a, b):
    return -(-a // b)


def _round_up(x, m):
    return _cdiv(x, m) * m


def _segment_kernel(x_ref, o_ref, *, s0, s1, s2, bias, logit_threshold):
    # x_ref: (1, 3, R, 128) pixel dtype (uint8 or float) in VMEM
    # o_ref: (1, R, 128) uint8 in VMEM
    x0 = x_ref[0, 0].astype(jnp.float32)     # (R, 128) dense, unmasked loads
    x1 = x_ref[0, 1].astype(jnp.float32)
    x2 = x_ref[0, 2].astype(jnp.float32)

    # Fused (/255, imagenet-normalize, 1x1 conv): three multiply-adds on VPU.
    acc = s0 * x0 + s1 * x1 + s2 * x2 + bias

    # sigmoid(acc) > t  <=>  acc > logit(t): just a compare, no EUP work.
    o_ref[0] = (acc > logit_threshold).astype(jnp.uint8)


def segment_forward(image, conv_w, conv_b, threshold=0.5):
    """image: (C,H,W) or (B,C,H,W), raw pixel values 0..255.

    Prefer uint8 input: the kernel is HBM-bound and casts in VMEM, so uint8
    moves 3 B/px of input traffic instead of 12 B/px for f32.
    Returns (B, 1, H, W) uint8 binary mask.
    """
    image = jnp.asarray(image)        # keep caller dtype (uint8 stays uint8)
    if image.ndim == 3:
        image = image[None]
    B, C, H, W = image.shape
    assert C == 3, "SegmentModelWrapper expects 3-channel images"

    # ---- fold constants into Python scalars baked into the kernel ----------
    w = [float(v) for v in jnp.asarray(conv_w, jnp.float32).reshape(3)]
    b = float(jnp.asarray(conv_b, jnp.float32).reshape(-1)[0])
    scale = [w[c] / (255.0 * IMAGENET_STD[c]) for c in range(3)]
    fused_bias = b - sum(w[c] * IMAGENET_MEAN[c] / IMAGENET_STD[c]
                         for c in range(3))

    t = float(threshold)
    if t <= 0.0:
        logit_t = -float("inf")       # sigmoid(acc) > 0 is always True
    elif t >= 1.0:
        logit_t = float("inf")        # sigmoid(acc) > 1 is always False
    else:
        logit_t = math.log(t / (1.0 - t))

    # ---- lane+sublane-dense spatial layout: (B, C, P128, 128) --------------
    P = H * W
    P128 = _cdiv(P, 128)
    pad = P128 * 128 - P

    x = image.reshape(B, C, P)
    if pad:
        # Only when H*W is not a multiple of 128 (rare); at most 127 px/image.
        x = jnp.pad(x, ((0, 0), (0, 0), (0, pad)))
    x = x.reshape(B, C, P128, 128)    # free reshape when pad == 0

    # Row tiling along P128; a ragged last block is fine (Pallas pads OOB
    # reads and drops OOB writes), so no full-tile padding or output slicing.
    R = P128 if P128 <= _MAX_ROWS else _MAX_ROWS
    n_tiles = _cdiv(P128, R)
    if B * n_tiles < 2 and P128 >= 2 * _ROW_GRANULE:
        # v7x has 2 TensorCores per chip; ensure >= 2 grid steps even for B==1.
        R = _round_up(_cdiv(P128, 2), _ROW_GRANULE)
        n_tiles = _cdiv(P128, R)

    kernel = functools.partial(
        _segment_kernel,
        s0=scale[0], s1=scale[1], s2=scale[2],
        bias=fused_bias, logit_threshold=logit_t,
    )

    out = pl.pallas_call(
        kernel,
        out_shape=jax.ShapeDtypeStruct((B, P128, 128), jnp.uint8),
        grid=(B, n_tiles),
        in_specs=[
            pl.BlockSpec((1, C, R, 128), lambda bi, ti: (bi, 0, ti, 0)),
        ],
        out_specs=pl.BlockSpec((1, R, 128), lambda bi, ti: (bi, ti, 0)),
        compiler_params=pltpu.CompilerParams(
            dimension_semantics=("parallel", "parallel"),
            vmem_limit_bytes=40 * 1024 * 1024,   # fits v7x's 64 MiB physical VMEM
        ),
    )(x)

    if pad:
        out = out.reshape(B, 1, P128 * 128)[:, :, :P]   # only for odd H*W
    return out.reshape(B, 1, H, W)


if __name__ == "__main__":
    key = jax.random.PRNGKey(0)
    k_img, k_w, k_b = jax.random.split(key, 3)

    # Small NCHW input consistent with the module: batch=2, channels=3, 16x16.
    B, C, H, W = 2, 3, 16, 16
    image_u8 = jax.random.randint(
        k_img, (B, C, H, W), 0, 256, dtype=jnp.int32
    ).astype(jnp.uint8)

    # Deterministic synthetic Conv2d(3, 1, kernel_size=1) parameters.
    conv_w = jax.random.normal(k_w, (3,), jnp.float32) * 0.5
    conv_b = jax.random.normal(k_b, (1,), jnp.float32) * 0.1
    threshold = 0.5

    out = segment_forward(image_u8, conv_w, conv_b, threshold=threshold)
    out = jax.block_until_ready(out)

    assert out.shape == (B, 1, H, W)
    assert out.dtype == jnp.uint8
    vals = jnp.unique(out)
    assert bool(jnp.all((vals == 0) | (vals == 1)))

    # Pure-JAX reference following the original (unfused) PyTorch formulation.
    mean = jnp.array(IMAGENET_MEAN, jnp.float32).reshape(1, 3, 1, 1)
    std = jnp.array(IMAGENET_STD, jnp.float32).reshape(1, 3, 1, 1)
    xf = image_u8.astype(jnp.float32) / 255.0
    xn = (xf - mean) / std
    logits = jnp.einsum("bchw,c->bhw", xn, conv_w)[:, None, :, :] + conv_b[0]
    ref = (jax.nn.sigmoid(logits) > threshold).astype(jnp.uint8)

    # ~1-ulp rounding differences from constant folding can only flip pixels
    # whose logit sits exactly at the threshold; allow a negligible count.
    mismatches = int(jnp.sum(out != ref))
    assert mismatches <= max(1, out.size // 1000), f"mismatches={mismatches}"

    print("KERNEL_OK")
</pallas_src>

<mosaic_0001>
module attributes {stable_mosaic.version = 11 : i64} {
  func.func @_segment_kernel(%arg0: i32, %arg1: i32, %arg2: memref<1x3x2x128xi8, #tpu.memory_space<vmem>>, %arg3: memref<1x2x128xi8, #tpu.memory_space<vmem>>) attributes {dimension_semantics = [#tpu.dimension_semantics<parallel>, #tpu.dimension_semantics<parallel>], iteration_bounds = array<i64: 2, 1>, scalar_prefetch = 0 : i64, scratch_operands = 0 : i64, tpu.core_type = #tpu.core_type<tc>, window_params = [{transform_indices = @transform_0, window_bounds = array<i64: 1, 3, 2, 128>}, {transform_indices = @transform_1, window_bounds = array<i64: 1, 2, 128>}]} {
    %c0 = arith.constant 0 : index
    %c0_0 = arith.constant 0 : index
    %c0_1 = arith.constant 0 : index
    %c0_2 = arith.constant 0 : index
    %0 = vector.load %arg2[%c0, %c0_0, %c0_1, %c0_2] : memref<1x3x2x128xi8, #tpu.memory_space<vmem>>, vector<1x1x2x128xi8>
    %1 = vector.shape_cast %0 : vector<1x1x2x128xi8> to vector<2x128xi8>
    %2 = arith.uitofp %1 : vector<2x128xi8> to vector<2x128xf32>
    %c0_3 = arith.constant 0 : index
    %c1 = arith.constant 1 : index
    %c0_4 = arith.constant 0 : index
    %c0_5 = arith.constant 0 : index
    %3 = vector.load %arg2[%c0_3, %c1, %c0_4, %c0_5] : memref<1x3x2x128xi8, #tpu.memory_space<vmem>>, vector<1x1x2x128xi8>
    %4 = vector.shape_cast %3 : vector<1x1x2x128xi8> to vector<2x128xi8>
    %5 = arith.uitofp %4 : vector<2x128xi8> to vector<2x128xf32>
    %c0_6 = arith.constant 0 : index
    %c2 = arith.constant 2 : index
    %c0_7 = arith.constant 0 : index
    %c0_8 = arith.constant 0 : index
    %6 = vector.load %arg2[%c0_6, %c2, %c0_7, %c0_8] : memref<1x3x2x128xi8, #tpu.memory_space<vmem>>, vector<1x1x2x128xi8>
    %7 = vector.shape_cast %6 : vector<1x1x2x128xi8> to vector<2x128xi8>
    %8 = arith.uitofp %7 : vector<2x128xi8> to vector<2x128xf32>
    %cst = arith.constant -0.0209132265 : f32
    %9 = vector.broadcast %cst : f32 to vector<2x128xf32>
    %10 = arith.mulf %9, %2 : vector<2x128xf32>
    %cst_9 = arith.constant -0.017819332 : f32
    %11 = vector.broadcast %cst_9 : f32 to vector<2x128xf32>
    %12 = arith.mulf %11, %5 : vector<2x128xf32>
    %13 = arith.addf %10, %12 : vector<2x128xf32>
    %cst_10 = arith.constant 0.00179123518 : f32
    %14 = vector.broadcast %cst_10 : f32 to vector<2x128xf32>
    %15 = arith.mulf %14, %8 : vector<2x128xf32>
    %16 = arith.addf %13, %15 : vector<2x128xf32>
    %cst_11 = arith.constant 4.60259247 : f32
    %17 = vector.broadcast %cst_11 : f32 to vector<2x128xf32>
    %18 = arith.addf %16, %17 : vector<2x128xf32>
    %cst_12 = arith.constant 0.000000e+00 : f32
    %19 = vector.broadcast %cst_12 : f32 to vector<2x128xf32>
    %20 = arith.cmpf ogt, %18, %19 : vector<2x128xf32>
    %21 = arith.extui %20 : vector<2x128xi1> to vector<2x128xi8>
    %c0_13 = arith.constant 0 : index
    %c0_14 = arith.constant 0 : index
    %c0_15 = arith.constant 0 : index
    %22 = vector.load %arg3[%c0_13, %c0_14, %c0_15] : memref<1x2x128xi8, #tpu.memory_space<vmem>>, vector<1x2x128xi8>
    %23 = vector.shape_cast %22 : vector<1x2x128xi8> to vector<2x128xi8>
    %24 = vector.shape_cast %21 : vector<2x128xi8> to vector<1x2x128xi8>
    tpu.vector_store %arg3[%c0_13, %c0_14, %c0_15], %24 {strides = array<i32>} : memref<1x2x128xi8, #tpu.memory_space<vmem>>, vector<1x2x128xi8>,
    return
  }
  func.func @transform_0(%arg0: i32, %arg1: i32) -> (i32, i32, i32, i32) {
    %c0_i32 = arith.constant 0 : i32
    %c0_i32_0 = arith.constant 0 : i32
    %c0_i32_1 = arith.constant 0 : i32
    return %arg0, %c0_i32, %arg1, %c0_i32_0 : i32, i32, i32, i32
  }
  func.func @transform_1(%arg0: i32, %arg1: i32) -> (i32, i32, i32) {
    %c0_i32 = arith.constant 0 : i32
    %c0_i32_0 = arith.constant 0 : i32
    return %arg0, %arg1, %c0_i32 : i32, i32, i32
  }
}

</mosaic_0001>

<bundles_post_ra>
// kernel: tpu_custom_call.1
= control target key start
LH: loop header
LB: loop body
LE: loop exit
PB: predicated region body
PF: predicated region fallthrough
CT: control target
= control target key end

     0   :  { %6 = vsyncpa [#allocation3], 0  ;;  %s522_s0 = inlined_call_operand.vmem [shape: u8[2,3,2,128], index: 0, kind: input, shape index: {}]   ;;  %s523_s1 = inlined_call_operand.hbm [shape: u8[2,2,128], index: 1, kind: output, shape index: {}]  }
   0x1   :  { %8 = vsyncpa [#allocation3 + $0x1], 0  ;;  %s410_s6 = smov 0   ;;  %s412_s7 = smov 0  }
   0x2   :  { %s414_s8 = smov 0   ;;  %s416_s9 = smov 0  }
   0x3   :  { %s418_s10 = smov 0   ;;  %s420_s11 = smov 0  }
   0x4 LB: > { %s251_s12 = sadd.s32 4294967295, %s396_s11   ;;  %s252_s13 = sadd.s32 4294967294, %s396_s11   ;;  %s396_s11 = sphi %s420_s11, %s14_s11   ;;  %s392_s10 = sphi %s418_s10, %s530_s10   ;;  %s388_s9 = sphi %s416_s9, %s529_s9   ;;  %s384_s8 = sphi %s414_s8, %s528_s8   ;;  %s380_s7 = sphi %s412_s7, %s527_s7   ;;  %s376_s6 = sphi %s410_s6, %s526_s6  }
   0x5   : > { %s26_s14 = sadd.s32 1, %s392_s10  ;;  %s63_s15 = sadd.s32 1, %s384_s8 }
   0x6   : > { %p28_p0 = scmp.ge.s32.totalorder %s26_s14, 2  ;;  %p73_p1 = scmp.ne.s32.totalorder %s384_s8, %s380_s7 }
   0x7   : > { %p74_p2 = scmp.eq.s32.totalorder %s251_s12, 1  ;;  %p79_p3 = scmp.ne.s32.totalorder %s380_s7, %s376_s6 }
   0x8   : > { %s532_s14 = smov (%p28_p0, %s26_s14), 0  ;;  %p80_p5 = scmp.eq.s32.totalorder %s252_s13, 1 }
   0x9   : > { %p450_p4 = por %p74_p2, %p73_p1  ;;  %s58_s17 = ssub.s32 %s392_s10, %s532_s14 }
   0xa   : > { %p255_p6 = scmp.ge.s32.totalorder %s396_s11, 1  ;;  %p61_p7 = scmp.eq.s32.totalorder %s58_s17, 0 }
   0xb   : > { %p457_p8 = por %p80_p5, %p79_p3  ;;  %p108_p9 = scmp.lt.s32.totalorder %s396_s11, 3 }
   0xc   : > { %s463_s19 = scalar_select %p61_p7, %s384_s8, %s63_s15  }
   0xd   : > { %p109_p10 = pnand %p255_p6, %p108_p9 }
   0xe   : > { %p129_p11 = scmp.lt.s32.totalorder (!%p109_p10), %s388_s9, 1  ;;  %s127_s25 = sand.u32 (!%p109_p10), 1, %s380_s7   ;;  %v398_v18 = vmov (!%p109_p10), 0   ;;  %vm164_vm1 = vcmask (!%p109_p10), 1040384   ;;  %vm165_vm2 = vsmask.f32 (!%p109_p10), 256 }
   0xf   : > { %112 = sbr.rel (%p109_p10) target bundleno = 65 (0x41), region = 24  ;;  %s258_s26 = sshll.u32 (!%p109_p10), %s388_s9, 4  ;;  %vm166_vm3 = vmand (!%p109_p10), %vm164_vm1, %vm165_vm2 }
  0x10   : > { %s128_s27 = scalar_lea.vmem (!%p109_p10), [#allocation2], %s127_s25  ;;  %s475_s2 = scalar_lea.hbm (!%p109_p10), %s523_s1, %s258_s26 }
  0x11   : > { %s184_s28 = sshll.u32 (!%p109_p10), %s128_s27, 4  ;;  %v167_v22 = vld [vmem:[%s128_s27] sm:$0x1] (!%p109_p10)  ;;  %s171_s3 = scalar_lea.sflag (!%p109_p10), [#allocation3], %s127_s25  ;;  %s477_s28 = int_to_ptr.vmem [resolvable:$true] %s184_s28 }
  0x12   : > { %s318_s4 = scalar_lea.vmem (!%p109_p10), %s477_s28, 16  ;;  %s399_s5 = smov (!%p109_p10), [#allocation2]  }
  0x13   : > { %p319_p12 = scmp.ne.s32.totalorder (!%p109_p10), %s477_s28, %s318_s4 }
  0x15   : > { %p320_p13 = pnand (!%p109_p10), %p319_p12, %p450_p4 }
  0x16   : > { %s130_s20 = scalar_select %p129_p11, %s388_s9, 1 }
  0x17   : > { %p321_p0 = pneg %p320_p13  ;;  %s322_s9 = sshll.u32 %s399_s5, 4  ;;  %s323_s9 = int_to_ptr.vmem [resolvable:$false] %s322_s9 }
  0x18   : > { %s261_s21 = smul.u32 3, %s130_s20  ;;  %s324_s12 = scalar_lea.vmem %s323_s9, 32 }
  0x19   : > { %p325_p1 = scmp.lt.s32.totalorder %s477_s28, %s323_s9  ;;  %p326_p2 = scmp.lt.s32.totalorder %s324_s12, %s318_s4 }
  0x1a   : > { %s135_s24 = scalar_lea.vmem %s522_s0, %s261_s21 }
  0x1b   : > { %v138_v0 = vld [vmem:[%s135_s24] sm:$0x1]  ;;  %v256_v1 = vld [vmem:[%s135_s24 + $0x1] sm:$0x1]  ;;  %v257_v2 = vld [vmem:[%s135_s24 + $0x2] sm:$0x1]  ;;  %p327_p3 = por %p326_p2, %p325_p1 }
  0x1c   : > { %v139_v3 = vunpack.c.0.s8 %v138_v0  ;;  %v144_v4 = vunpack.c.0.s8 %v256_v1  ;;  %v149_v5 = vunpack.c.0.s8 %v257_v2 }
  0x1d   : > { %p328_p5 = pnand %p327_p3, %p321_p0 }
  0x1e   : > { %v140_v6 = vand.u32 255, %v139_v3  ;;  %v145_v7 = vand.u32 255, %v144_v4  ;;  %v150_v8 = vand.u32 255, %v149_v5 }
  0x20   : > { %v141_v9 = vcvt.s32.f32 %v140_v6  ;;  %v146_v10 = vcvt.s32.f32 %v145_v7  ;;  %v151_v11 = vcvt.s32.f32 %v150_v8 }
  0x22   : > { %v152_v12 = vmul.f32 -0.020913227, %v141_v9  ;;  %v153_v13 = vmul.f32 -0.017819332, %v146_v10  ;;  %v155_v14 = vmul.f32 0.0017912352, %v151_v11 }
  0x24   : > { %v154_v15 = vadd.f32 %v153_v13, %v152_v12 }
  0x26   : > { %v156_v16 = vadd.f32 %v155_v14, %v154_v15 }
  0x28   : > { %v157_v17 = vadd.f32 4.6025925, %v156_v16 }
  0x2a   : > { %vm158_vm0 = vcmp.gt.f32.partialorder %v157_v17, 0.0 }
  0x2b   : > { %v159_v19 = vsel %vm158_vm0, 1, %v398_v18 }
  0x2c   : > { %v160_v20 = vpack.c.b16 %v159_v19, %v159_v19 }
  0x2e   : > { %v161_v21 = vpack.c.b8 %v160_v20, %v160_v20 }
  0x30   : > { %vm162_vm4 = vnez %v161_v21 }
  0x31   : > { %v163_v23 = vsel %vm162_vm4, 16843009, %v398_v18 }
  0x32   : > { %v168_v24 = vsel %vm166_vm3, %v163_v23, %v167_v22 }
  0x33   : > { %169 = vst [vmem:[%s128_s27] sm:$0x1] %v168_v24 }
  0x34   : > { %331 = shalt.err (!%p328_p5)
}
  0x35   : > { %s332_s13 = scalar_lea.hbm %s475_s2, 16  ;;  %s336_s20 = scalar_lea.hbm %s523_s1, 32 }
  0x36   : > { %p333_p6 = scmp.ne.s32.totalorder %s475_s2, %s332_s13  ;;  %p337_p10 = scmp.lt.u32.totalorder %s475_s2, %s523_s1 }
  0x37   : > { %p338_p11 = scmp.lt.u32.totalorder %s336_s20, %s332_s13  ;;  %p340_p13 = scmp.lt.u32.totalorder %s332_s13, %s475_s2 }
  0x38   : > { %p334_p7 = pnand %p333_p6, %p450_p4 }
  0x39   : > { %p339_p12 = por %p338_p11, %p337_p10 }
  0x3a   : > { %p335_p9 = pneg %p334_p7 }
  0x3b   : > { %p341_p0 = por %p340_p13, %p339_p12 }
  0x3d   : > { %p342_p1 = pnand %p341_p0, %p335_p9 }
  0x3f   : > { %345 = shalt.err (!%p342_p1)
}
  0x40   : > { %262 = dma.vmem_to_hbm [thread:$0]  (%p450_p4), %s477_s28, 16, %s475_s2, %s171_s3  }
  0x41 PF: > { %p268_p2 = scmp.ge.s32.totalorder %s396_s11, 2  ;;  %s196_s23 = sand.u32 1, %s376_s6  }
  0x42   : > { %s197_s24 = scalar_lea.sflag [#allocation3], %s196_s23 }
  0x43   : > { %p265_p3 = pnand %p268_p2, %p457_p8 }
  0x45   : > { %371 = dma.done.wait (!%p265_p3), %s197_s24, 16  }
  0x46   : > { %373 = vsyncadd (!%p265_p3), %s197_s24, 4294967280  ;;  %s14_s11 = sadd.s32 1, %s396_s11   ;;  %s526_s6 = smov %s380_s7 }
  0x47   : > { %p11_p5 = scmp.ge.s32.totalorder %s14_s11, 4   ;;  %s527_s7 = smov %s384_s8 }
  0x48   : > { %s528_s8 = smov %s463_s19  ;;  %s529_s9 = smov %s392_s10 }
  0x49   : > { %s530_s10 = smov %s532_s14  ;;  %13 = sbr.rel (!%p11_p5) target bundleno = 4 (0x4), region = 61 }
  0x50   :  { %201 = vsyncpa [#allocation3], 1 }
  0x51   :  { %203 = vsyncpa [#allocation3 + $0x1], 1 }

</bundles_post_ra>
